<compile_context>
chip_gen: v7x
topology: tpu7x:2x2x1
jax: 0.10.0
libtpu: 0.0.40
codegen_flags: <defaults>
</compile_context>

<pallas_src>
import jax
import jax.numpy as jnp
from jax.experimental import pallas as pl
from jax.experimental.pallas import tpu as pltpu


# ---------------------------------------------------------------------------
# Kernel: out[b] = img[b] . w_eff_img + mean_s(txt[b]) . w_eff_txt + b_eff
# ---------------------------------------------------------------------------
def align_fold_kernel(img_ref, txt_ref, w_img_ref, w_txt_ref, b_ref, out_ref):
    img = img_ref[...]                                   # [B, 2048]
    txt = txt_ref[...]                                   # [B, S, 768]
    S = txt.shape[1]

    # text mean folded as sum * (1/S); sublane reduce over S, then lane reduce.
    txt_sum = jnp.sum(txt, axis=1)                       # [B, 768]

    img_term = jnp.sum(img * w_img_ref[...], axis=-1, keepdims=True)       # [B, 1]
    txt_term = jnp.sum(txt_sum * w_txt_ref[...], axis=-1, keepdims=True) * (1.0 / S)

    out_ref[...] = img_term + txt_term + b_ref[...]      # [B, 1]


# ---------------------------------------------------------------------------
# One-time offline fold of the full post-backbone affine chain.
# ---------------------------------------------------------------------------
def fold_params(p):
    """Fold fc <- out_proj <- v_proj <- cross-attn projs <- image/text proj.

    Returns effective weights such that (in exact arithmetic)
      out = img @ w_eff_img.T + mean_s(txt) @ w_eff_txt.T + b_eff
    matches the original forward.
    """
    f = p["w_fc"].reshape(-1, 1)                         # [512, 1]
    wo_f = p["w_o"] @ f                                  # [512, 1]
    g = p["w_v"] @ wo_f                                  # [512, 1]
    g_i = p["w_cai"] @ g                                 # [512, 1]
    g_t = p["w_cat"] @ g                                 # [512, 1]

    w_eff_img = (p["w_ip"] @ g_i).reshape(1, -1)         # [1, 2048]
    w_eff_txt = (p["w_tp"] @ g_t).reshape(1, -1)         # [1, 768]

    b_eff = (p["b_ip"] @ g_i + p["b_tp"] @ g_t
             + (p["b_cai"] + p["b_cat"]) @ g
             + 2.0 * (p["b_v"] @ wo_f)
             + 2.0 * (p["b_o"] @ f)
             + p["b_fc"])                                # [1, 1]

    return {
        "w_eff_img": w_eff_img.astype(jnp.float32),
        "w_eff_txt": w_eff_txt.astype(jnp.float32),
        "b_eff": b_eff.astype(jnp.float32),
    }


# ---------------------------------------------------------------------------
# Wrapper
# ---------------------------------------------------------------------------
def alignment_forward(image_features, text_hidden, folded):
    B = image_features.shape[0]

    inputs = (
        image_features,            # [B, 2048]
        text_hidden,               # [B, S, 768]
        folded["w_eff_img"],       # [1, 2048]
        folded["w_eff_txt"],       # [1, 768]
        folded["b_eff"],           # [1, 1]
    )

    def full_spec(x):
        nd = x.ndim
        return pl.BlockSpec(x.shape, lambda i, _nd=nd: (0,) * _nd)

    return pl.pallas_call(
        align_fold_kernel,
        out_shape=jax.ShapeDtypeStruct((B, 1), jnp.float32),
        grid_spec=pltpu.PrefetchScalarGridSpec(
            num_scalar_prefetch=0,
            grid=(1,),                      # B is tiny; keep a single grid step
            in_specs=[full_spec(x) for x in inputs],
            out_specs=pl.BlockSpec((B, 1), lambda i: (0, 0)),
        ),
        compiler_params=pltpu.CompilerParams(
            dimension_semantics=("arbitrary",),
            vmem_limit_bytes=32 * 1024 * 1024,   # fits v5e/v6e/v7x
        ),
    )(*inputs)


# ---------------------------------------------------------------------------
# Original (unfolded) parameterization + pure-JAX reference for correctness.
# ---------------------------------------------------------------------------
def init_params(key, common_embed_dim=512, image_feat_dim=2048, text_hidden_dim=768):
    ks = jax.random.split(key, 16)
    s = 0.02

    def w(k, shape):
        return jax.random.normal(k, shape, dtype=jnp.float32) * s

    E = common_embed_dim
    # PyTorch nn.MultiheadAttention stores in_proj_weight [3E, E]; only the V
    # slice [2E:3E] affects the output when keys have length 1 (softmax == 1).
    in_proj_w = w(ks[8], (3 * E, E))
    in_proj_b = w(ks[9], (3 * E,))
    return {
        # weights stored as [in, out] (transpose of PyTorch's [out, in])
        "w_ip":  w(ks[0], (image_feat_dim, E)),  "b_ip":  w(ks[1], (1, E)),
        "w_tp":  w(ks[2], (text_hidden_dim, E)), "b_tp":  w(ks[3], (1, E)),
        "w_cai": w(ks[4], (E, E)),               "b_cai": w(ks[5], (1, E)),
        "w_cat": w(ks[6], (E, E)),               "b_cat": w(ks[7], (1, E)),
        "w_v":   in_proj_w[2 * E:3 * E, :].T,    "b_v":   in_proj_b[2 * E:3 * E].reshape(1, E),
        "w_o":   w(ks[10], (E, E)),              "b_o":   w(ks[11], (1, E)),
        "w_fc":  w(ks[12], (1, E)),              "b_fc":  w(ks[13], (1, 1)),
    }


def reference_forward(image_features, text_hidden, p):
    """Pure-JAX reference mirroring the PyTorch forward (post-backbone)."""
    ip = image_features @ p["w_ip"] + p["b_ip"]
    tm = jnp.mean(text_hidden, axis=1)
    tp = tm @ p["w_tp"] + p["b_tp"]
    ci = ip @ p["w_cai"] + p["b_cai"]
    ct = tp @ p["w_cat"] + p["b_cat"]
    att_img = (ct @ p["w_v"] + p["b_v"]) @ p["w_o"] + p["b_o"]
    att_txt = (ci @ p["w_v"] + p["b_v"]) @ p["w_o"] + p["b_o"]
    combined = att_img + att_txt
    return jnp.sum(combined * p["w_fc"], axis=-1, keepdims=True) + p["b_fc"]


if __name__ == "__main__":
    key = jax.random.PRNGKey(0)
    k_img, k_txt, k_par = jax.random.split(key, 3)

    B, S = 2, 8
    image_features = jax.random.normal(k_img, (B, 2048), dtype=jnp.float32)
    text_hidden = jax.random.normal(k_txt, (B, S, 768), dtype=jnp.float32)

    params = init_params(k_par)
    folded = jax.tree_util.tree_map(jax.block_until_ready, fold_params(params))

    out = alignment_forward(image_features, text_hidden, folded)
    out = jax.block_until_ready(out)

    ref = reference_forward(image_features, text_hidden, params)
    assert out.shape == (B, 1)
    # Offline affine fold reassociates f32 sums -> slightly looser tolerance.
    assert jnp.allclose(out, ref, rtol=2e-3, atol=1e-5), (out, ref)
    print("KERNEL_OK")
</pallas_src>

<mosaic_0001>
module attributes {stable_mosaic.version = 11 : i64} {
  func.func @align_fold_kernel(%arg0: i32, %arg1: memref<2x2048xf32, #tpu.memory_space<vmem>>, %arg2: memref<2x8x768xf32, #tpu.memory_space<vmem>>, %arg3: memref<1x2048xf32, #tpu.memory_space<vmem>>, %arg4: memref<1x768xf32, #tpu.memory_space<vmem>>, %arg5: memref<1x1xf32, #tpu.memory_space<vmem>>, %arg6: memref<2x1xf32, #tpu.memory_space<vmem>>) attributes {dimension_semantics = [#tpu.dimension_semantics<arbitrary>], iteration_bounds = array<i64: 1>, scalar_prefetch = 0 : i64, scratch_operands = 0 : i64, tpu.core_type = #tpu.core_type<tc>, window_params = [{pipeline_mode = #tpu.pipeline_mode<synchronous>, transform_indices = @transform_0, window_bounds = array<i64: 2, 2048>}, {pipeline_mode = #tpu.pipeline_mode<synchronous>, transform_indices = @transform_1, window_bounds = array<i64: 2, 8, 768>}, {pipeline_mode = #tpu.pipeline_mode<synchronous>, transform_indices = @transform_2, window_bounds = array<i64: 1, 2048>}, {pipeline_mode = #tpu.pipeline_mode<synchronous>, transform_indices = @transform_3, window_bounds = array<i64: 1, 768>}, {pipeline_mode = #tpu.pipeline_mode<synchronous>, transform_indices = @transform_4, window_bounds = array<i64: 1, 1>}, {pipeline_mode = #tpu.pipeline_mode<synchronous>, transform_indices = @transform_5, window_bounds = array<i64: 2, 1>}]} {
    %c0 = arith.constant 0 : index
    %c0_0 = arith.constant 0 : index
    %0 = vector.load %arg1[%c0, %c0_0] : memref<2x2048xf32, #tpu.memory_space<vmem>>, vector<2x2048xf32>
    %c0_1 = arith.constant 0 : index
    %c0_2 = arith.constant 0 : index
    %c0_3 = arith.constant 0 : index
    %1 = vector.load %arg2[%c0_1, %c0_2, %c0_3] : memref<2x8x768xf32, #tpu.memory_space<vmem>>, vector<2x8x768xf32>
    %cst = arith.constant dense<0.000000e+00> : vector<2x768xf32>
    %2 = vector.multi_reduction <add>, %1, %cst [1] : vector<2x8x768xf32> to vector<2x768xf32>
    %c0_4 = arith.constant 0 : index
    %c0_5 = arith.constant 0 : index
    %3 = vector.load %arg3[%c0_4, %c0_5] : memref<1x2048xf32, #tpu.memory_space<vmem>>, vector<1x2048xf32>
    %4 = vector.broadcast %3 : vector<1x2048xf32> to vector<2x2048xf32>
    %5 = arith.mulf %0, %4 : vector<2x2048xf32>
    %cst_6 = arith.constant dense<0.000000e+00> : vector<2xf32>
    %6 = vector.multi_reduction <add>, %5, %cst_6 [1] : vector<2x2048xf32> to vector<2xf32>
    %7 = vector.shape_cast %6 : vector<2xf32> to vector<2x1xf32>
    %c0_7 = arith.constant 0 : index
    %c0_8 = arith.constant 0 : index
    %8 = vector.load %arg4[%c0_7, %c0_8] : memref<1x768xf32, #tpu.memory_space<vmem>>, vector<1x768xf32>
    %9 = vector.broadcast %8 : vector<1x768xf32> to vector<2x768xf32>
    %10 = arith.mulf %2, %9 : vector<2x768xf32>
    %cst_9 = arith.constant dense<0.000000e+00> : vector<2xf32>
    %11 = vector.multi_reduction <add>, %10, %cst_9 [1] : vector<2x768xf32> to vector<2xf32>
    %12 = vector.shape_cast %11 : vector<2xf32> to vector<2x1xf32>
    %cst_10 = arith.constant 1.250000e-01 : f32
    %13 = vector.broadcast %cst_10 : f32 to vector<2x1xf32>
    %14 = arith.mulf %12, %13 : vector<2x1xf32>
    %15 = arith.addf %7, %14 : vector<2x1xf32>
    %c0_11 = arith.constant 0 : index
    %c0_12 = arith.constant 0 : index
    %16 = vector.load %arg5[%c0_11, %c0_12] : memref<1x1xf32, #tpu.memory_space<vmem>>, vector<1x1xf32>
    %17 = vector.broadcast %16 : vector<1x1xf32> to vector<2x1xf32>
    %18 = arith.addf %15, %17 : vector<2x1xf32>
    %c0_13 = arith.constant 0 : index
    %c0_14 = arith.constant 0 : index
    %19 = vector.load %arg6[%c0_13, %c0_14] : memref<2x1xf32, #tpu.memory_space<vmem>>, vector<2x1xf32>
    tpu.vector_store %arg6[%c0_13, %c0_14], %18 {strides = array<i32>} : memref<2x1xf32, #tpu.memory_space<vmem>>, vector<2x1xf32>,
    return
  }
  func.func @transform_0(%arg0: i32) -> (i32, i32) {
    %c0_i32 = arith.constant 0 : i32
    %c0_i32_0 = arith.constant 0 : i32
    %c0_i32_1 = arith.constant 0 : i32
    return %c0_i32, %c0_i32_0 : i32, i32
  }
  func.func @transform_1(%arg0: i32) -> (i32, i32, i32) {
    %c0_i32 = arith.constant 0 : i32
    %c0_i32_0 = arith.constant 0 : i32
    %c0_i32_1 = arith.constant 0 : i32
    %c0_i32_2 = arith.constant 0 : i32
    return %c0_i32, %c0_i32_0, %c0_i32_1 : i32, i32, i32
  }
  func.func @transform_2(%arg0: i32) -> (i32, i32) {
    %c0_i32 = arith.constant 0 : i32
    %c0_i32_0 = arith.constant 0 : i32
    %c0_i32_1 = arith.constant 0 : i32
    return %c0_i32, %c0_i32_0 : i32, i32
  }
  func.func @transform_3(%arg0: i32) -> (i32, i32) {
    %c0_i32 = arith.constant 0 : i32
    %c0_i32_0 = arith.constant 0 : i32
    %c0_i32_1 = arith.constant 0 : i32
    return %c0_i32, %c0_i32_0 : i32, i32
  }
  func.func @transform_4(%arg0: i32) -> (i32, i32) {
    %c0_i32 = arith.constant 0 : i32
    %c0_i32_0 = arith.constant 0 : i32
    %c0_i32_1 = arith.constant 0 : i32
    return %c0_i32, %c0_i32_0 : i32, i32
  }
  func.func @transform_5(%arg0: i32) -> (i32, i32) {
    %c0_i32 = arith.constant 0 : i32
    %c0_i32_0 = arith.constant 0 : i32
    %c0_i32_1 = arith.constant 0 : i32
    return %c0_i32, %c0_i32_0 : i32, i32
  }
}

</mosaic_0001>

<bundles_post_ra>
// kernel: tpu_custom_call.1
= control target key start
LH: loop header
LB: loop body
LE: loop exit
PB: predicated region body
PF: predicated region fallthrough
CT: control target
= control target key end

     0   :  { %s825_s0 = inlined_call_operand.hbm [shape: f32[2,2048], index: 0, kind: input, shape index: {}]   ;;  %s826_s1 = inlined_call_operand.hbm [shape: f32[2,8,768], index: 1, kind: input, shape index: {}]   ;;  %s827_s2 = inlined_call_operand.hbm [shape: f32[1,2048], index: 2, kind: input, shape index: {}]   ;;  %s828_s3 = inlined_call_operand.vmem [shape: f32[1,768], index: 3, kind: input, shape index: {}]   ;;  %s829_s4 = inlined_call_operand.<no memory space> [shape: f32[1,1], index: 4, kind: input, shape index: {}]   ;;  %s830_s5 = inlined_call_operand.vmem [shape: f32[2,1], index: 5, kind: output, shape index: {}]  }
   0x1   :  { %v10_v0 = vstv %s829_s4 }
   0x2   :  { %11 = vst [vmem:[#allocation2] sm:$0x1] %v10_v0 }
   0x3   :  { %12 = vsyncpa [#allocation4], 0 }
   0x4   :  { %13 = vsyncpa [#allocation6], 0  ;;  %s596_s20 = smov [#allocation5]   ;;  %s526_s24 = scalar_lea.hbm %s826_s1, 1536 }
   0x5   :  { %s29_s21 = sshll.u32 %s596_s20, 4  ;;  %p527_p0 = scmp.ne.s32.totalorder %s826_s1, %s526_s24  ;;  %s30_s21 = int_to_ptr.vmem [resolvable:$true] %s29_s21 }
   0x6   :  { %p530_p1 = scmp.lt.u32.totalorder %s526_s24, %s826_s1 }
   0x8   :  { %p532_p2 = pnand %p530_p1, %p527_p0 }
   0xa   :  { %535 = shalt.err (!%p532_p2)
}
   0xb   :  { %s536_s4 = scalar_lea.vmem %s30_s21, 1536  ;;  %p541_p4 = scmp.lt.s32.totalorder %s30_s21, %s30_s21 }
   0xc   :  { %p537_p3 = scmp.ne.s32.totalorder %s30_s21, %s536_s4  ;;  %p542_p5 = scmp.lt.s32.totalorder %s536_s4, %s536_s4 }
   0xe   :  { %p543_p6 = por %p542_p5, %p541_p4 }
  0x10   :  { %p544_p7 = pnand %p543_p6, %p537_p3 }
  0x12   :  { %547 = shalt.err (!%p544_p7)
}
  0x13   :  { %s597_s29 = smov 768   ;;  %s598_s30 = smov 48  }
  0x14   :  { %35 = dma.hbm_to_vmem [thread:$0]  %s826_s1, 1536, %s30_s21, [#allocation6], %s597_s29, %s597_s29, %s598_s30  }
  0x15   :  { %s599_s8 = smov [#allocation3]   ;;  %s600_s10 = smov [#allocation7]  }
  0x16   :  { %s20_s9 = sshll.u32 %s599_s8, 4  ;;  %s42_s11 = sshll.u32 %s600_s10, 4  ;;  %s21_s9 = int_to_ptr.vmem [resolvable:$true] %s20_s9  ;;  %s43_s11 = int_to_ptr.vmem [resolvable:$true] %s42_s11 }
  0x17   :  { %s548_s14 = scalar_lea.hbm %s825_s0, 512 }
  0x18   :  { %p549_p8 = scmp.ne.s32.totalorder %s825_s0, %s548_s14  ;;  %p552_p9 = scmp.lt.u32.totalorder %s548_s14, %s825_s0 }
  0x1a   :  { %p554_p10 = pnand %p552_p9, %p549_p8 }
  0x1c   :  { %557 = shalt.err (!%p554_p10)
}
  0x1d   :  { %s558_s1 = scalar_lea.vmem %s21_s9, 512  ;;  %p563_p12 = scmp.lt.s32.totalorder %s21_s9, %s21_s9 }
  0x1e   :  { %p559_p11 = scmp.ne.s32.totalorder %s21_s9, %s558_s1  ;;  %p564_p13 = scmp.lt.s32.totalorder %s558_s1, %s558_s1 }
  0x20   :  { %p565_p0 = por %p564_p13, %p563_p12 }
  0x22   :  { %p566_p1 = pnand %p565_p0, %p559_p11 }
  0x24   :  { %569 = shalt.err (!%p566_p1)
}
  0x25   :  { %23 = dma.hbm_to_vmem [thread:$0]  %s825_s0, 512, %s21_s9, [#allocation4]  }
  0x26   :  { %s570_s23 = scalar_lea.hbm %s827_s2, 256 }
  0x27   :  { %p571_p2 = scmp.ne.s32.totalorder %s827_s2, %s570_s23  ;;  %p574_p3 = scmp.lt.u32.totalorder %s570_s23, %s827_s2 }
  0x29   :  { %p576_p4 = pnand %p574_p3, %p571_p2 }
  0x2b   :  { %579 = shalt.err (!%p576_p4)
}
  0x2c   :  { %s580_s28 = scalar_lea.vmem %s43_s11, 256  ;;  %p585_p6 = scmp.lt.s32.totalorder %s43_s11, %s43_s11 }
  0x2d   :  { %p581_p5 = scmp.ne.s32.totalorder %s43_s11, %s580_s28  ;;  %p586_p7 = scmp.lt.s32.totalorder %s580_s28, %s580_s28 }
  0x2f   :  { %p587_p8 = por %p586_p7, %p585_p6 }
  0x31   :  { %p588_p9 = pnand %p587_p8, %p581_p5 }
  0x33   :  { %591 = shalt.err (!%p588_p9)
}
  0x34   :  { %45 = dma.hbm_to_vmem [thread:$0]  %s827_s2, 256, %s43_s11, [#allocation6]  }
  0x35   :  { %592 = dma.done.wait [#allocation4], 512  }
  0x36   :  { %593 = vsyncadd [#allocation4], 4294966784 }
  0x37   :  { %594 = dma.done.wait [#allocation6], 1792  }
  0x38   :  { %595 = vsyncadd [#allocation6], 4294965504  ;;  %v151_v1 = vlaneseq  ;;  %v601_v2 = vmov 1983009808   ;;  %v63_v9 = vld [vmem:[#allocation5] sm:$0xff]  ;;  %v64_v10 = vld [vmem:[#allocation5 + $0x8] sm:$0xff] }
  0x39   :  { %v218_v3 = vunpack.c.l.s4 %v601_v2  ;;  %v65_v11 = vld [vmem:[#allocation5 + $0x10] sm:$0xff]  ;;  %v66_v15 = vld [vmem:[#allocation5 + $0x18] sm:$0xff]  ;;  %v67_v16 = vld [vmem:[#allocation5 + $0x20] sm:$0xff]  ;;  %v75_v18 = vrot.slane %v63_v9, 4  ;;  %v81_v19 = vrot.slane %v64_v10, 4  ;;  %vm470_vm0 = vcmask 1041409  }
  0x3a   :  { %v671_v4 = vshrl.u32 %v151_v1, 7  ;;  %v68_v17 = vld [vmem:[#allocation5 + $0x28] sm:$0xff]  ;;  %v87_v20 = vrot.slane %v65_v11, 4  ;;  %v69_v22 = vld [vmem:[#allocation5 + $0x30] sm:$0xff]  ;;  %v70_v23 = vld [vmem:[#allocation5 + $0x38] sm:$0xff]  ;;  %v93_v24 = vrot.slane %v66_v15, 4 }
  0x3b   :  { %v219_v5 = vunpack.c.0.s8 %v218_v3  ;;  %v99_v25 = vrot.slane %v67_v16, 4  ;;  %v105_v26 = vrot.slane %v68_v17, 4  ;;  %v76_v28 = vadd.f32 %v75_v18, %v63_v9  ;;  %v71_v56 = vld [vmem:[#allocation5 + $0x40] sm:$0xff]  ;;  %v72_v57 = vld [vmem:[#allocation5 + $0x48] sm:$0xff]  ;;  %v73_v58 = vld [vmem:[#allocation5 + $0x50] sm:$0xff] }
  0x3c   :  { %v674_v6 = vsub.s32 0, %v671_v4  ;;  %v677_v7 = vsub.s32 1, %v671_v4  ;;  %v680_v8 = vsub.s32 2, %v671_v4  ;;  %v683_v12 = vsub.s32 3, %v671_v4  ;;  %v74_v63 = vld [vmem:[#allocation5 + $0x58] sm:$0xff]  ;;  %v699_v3 = vld [vmem:[#allocation7] sm:$0xff] }
  0x3d   :  { %v686_v13 = vsub.s32 4, %v671_v4  ;;  %v689_v14 = vsub.s32 5, %v671_v4  ;;  %v692_v21 = vsub.s32 %v219_v5, %v671_v4  ;;  %v177_v27 = vsub.s32 6, %v671_v4 }
  0x3e   :  { %v82_v29 = vadd.f32 %v81_v19, %v64_v10  ;;  %v88_v30 = vadd.f32 %v87_v20, %v65_v11  ;;  %v111_v31 = vrot.slane %v69_v22, 4  ;;  %v94_v32 = vadd.f32 %v93_v24, %v66_v15 }
  0x3f   :  { %v100_v33 = vadd.f32 %v99_v25, %v67_v16  ;;  %v106_v34 = vadd.f32 %v105_v26, %v68_v17  ;;  %v117_v35 = vrot.slane %v70_v23, 4  ;;  %v77_v36 = vrot.slane %v76_v28, 2 }
  0x40   :  { %v83_v37 = vrot.slane %v82_v29, 2  ;;  %v89_v38 = vrot.slane %v88_v30, 2  ;;  %v112_v39 = vadd.f32 %v111_v31, %v69_v22  ;;  %v95_v40 = vrot.slane %v94_v32, 2 }
  0x41   :  { %v101_v41 = vrot.slane %v100_v33, 2  ;;  %v107_v42 = vrot.slane %v106_v34, 2  ;;  %v118_v43 = vadd.f32 %v117_v35, %v70_v23  ;;  %v78_v44 = vadd.f32 %v77_v36, %v76_v28 }
  0x42   :  { %v84_v45 = vadd.f32 %v83_v37, %v82_v29  ;;  %v90_v46 = vadd.f32 %v89_v38, %v88_v30  ;;  %v113_v47 = vrot.slane %v112_v39, 2  ;;  %v96_v48 = vadd.f32 %v95_v40, %v94_v32  ;;  %v714_v29 = vld [vmem:[#allocation7 + $0x8] sm:$0xff] }
  0x43   :  { %v102_v49 = vadd.f32 %v101_v41, %v100_v33  ;;  %v108_v50 = vadd.f32 %v107_v42, %v106_v34  ;;  %v119_v51 = vrot.slane %v118_v43, 2  ;;  %v79_v52 = vrot.slane %v78_v44, 1 }
  0x44   :  { %v85_v53 = vrot.slane %v84_v45, 1  ;;  %v91_v54 = vrot.slane %v90_v46, 1  ;;  %v114_v55 = vadd.f32 %v113_v47, %v112_v39  ;;  %v97_v59 = vrot.slane %v96_v48, 1 }
  0x45   :  { %v103_v60 = vrot.slane %v102_v49, 1  ;;  %v109_v61 = vrot.slane %v108_v50, 1  ;;  %v120_v62 = vadd.f32 %v119_v51, %v118_v43  ;;  %v695_v0 = vadd.f32 %v79_v52, %v78_v44  ;;  %v413_v51 = vld [vmem:[%s828_s3] sm:$0x3f] }
  0x46   :  { %v697_v1 = vadd.f32 %v85_v53, %v84_v45  ;;  %v115_v2 = vrot.slane %v114_v55, 1  ;;  %v181_v5 = vsub.s32 7, %v671_v4  ;;  %v702_v9 = vadd.f32 %v91_v54, %v90_v46 }
  0x47   :  { %v704_v10 = vadd.f32 %v97_v59, %v96_v48  ;;  %v706_v11 = vadd.f32 %v103_v60, %v102_v49  ;;  %v708_v15 = vadd.f32 %v109_v61, %v108_v50  ;;  %v121_v16 = vrot.slane %v120_v62, 1 }
  0x48   :  { %v123_v17 = vrot.slane %v71_v56, 4  ;;  %v129_v18 = vrot.slane %v72_v57, 4  ;;  %v135_v19 = vrot.slane %v73_v58, 4  ;;  %v116_v20 = vadd.f32 %v115_v2, %v114_v55 }
  0x49   :  { %v141_v22 = vrot.slane %v74_v63, 4  ;;  %v154_v23 = vrot.slane %v699_v3, %v674_v6  ;;  %v158_v24 = vrot.slane %v699_v3, %v677_v7  ;;  %v162_v30 = vrot.slane %v699_v3, %v680_v8 }
  0x4a   :  { %v124_v25 = vadd.f32 %v123_v17, %v71_v56  ;;  %v130_v26 = vadd.f32 %v129_v18, %v72_v57  ;;  %v136_v28 = vadd.f32 %v135_v19, %v73_v58  ;;  %v166_v32 = vrot.slane %v699_v3, %v683_v12 }
  0x4b   :  { %v142_v31 = vadd.f32 %v141_v22, %v74_v63  ;;  %v170_v33 = vrot.slane %v699_v3, %v686_v13  ;;  %v174_v34 = vrot.slane %v699_v3, %v689_v14  ;;  %v122_v35 = vadd.f32 %v121_v16, %v120_v62 }
  0x4c   :  { %v125_v36 = vrot.slane %v124_v25, 2  ;;  %v131_v37 = vrot.slane %v130_v26, 2  ;;  %v137_v38 = vrot.slane %v136_v28, 2  ;;  %v186_v40 = vrot.slane %v714_v29, %v674_v6 }
  0x4d   :  { %v143_v39 = vrot.slane %v142_v31, 2  ;;  %v194_v41 = vrot.slane %v714_v29, %v680_v8  ;;  %v198_v42 = vrot.slane %v714_v29, %v683_v12  ;;  %v190_v46 = vrot.slane %v714_v29, %v677_v7 }
  0x4e   :  { %v126_v43 = vadd.f32 %v125_v36, %v124_v25  ;;  %v132_v44 = vadd.f32 %v131_v37, %v130_v26  ;;  %v138_v45 = vadd.f32 %v137_v38, %v136_v28  ;;  %v215_v48 = vcombine.low %v154_v23, %v158_v24 }
  0x4f   :  { %v144_v47 = vadd.f32 %v143_v39, %v142_v31  ;;  %v216_v49 = vcombine.low %v162_v30, %v166_v32  ;;  %v732_v50 = vcombine.low %v170_v33, %v174_v34  ;;  %v206_v55 = vrot.slane %v714_v29, %v689_v14  ;;  %v59_v31 = vld [vmem:[#allocation3] sm:$0xff] }
  0x50   :  { %v127_v52 = vrot.slane %v126_v43, 1  ;;  %v133_v53 = vrot.slane %v132_v44, 1  ;;  %v139_v54 = vrot.slane %v138_v45, 1  ;;  %v223_v57 = vrot.slane %v215_v48, %v692_v21 }
  0x51   :  { %v145_v56 = vrot.slane %v144_v47, 1  ;;  %v230_v58 = vrot.slane %v216_v49, %v692_v21  ;;  %v741_v59 = vcombine.low %v194_v41, %v198_v42  ;;  %vm379_vm1 = vcmask 1041408  }
  0x52   :  { %v128_v60 = vadd.f32 %v127_v52, %v126_v43  ;;  %v134_v61 = vadd.f32 %v133_v53, %v132_v44  ;;  %v240_v62 = vrot.slane %v732_v50, %v692_v21  ;;  %v418_v63 = vrot.slane %v413_v51, %v674_v6 }
  0x53   :  { %v140_v2 = vadd.f32 %v139_v54, %v138_v45  ;;  %v146_v16 = vadd.f32 %v145_v56, %v144_v47  ;;  %v422_v17 = vrot.slane %v413_v51, %v677_v7  ;;  %v426_v18 = vrot.slane %v413_v51, %v680_v8 }
  0x54   :  { %v231_v19 = vcombine.low %v223_v57, %v230_v58  ;;  %v430_v22 = vrot.slane %v413_v51, %v683_v12  ;;  %v434_v23 = vrot.slane %v413_v51, %v686_v13  ;;  %v438_v24 = vrot.slane %v413_v51, %v689_v14 }
  0x55   :  { %v445_v25 = vmul.f32 %v418_v63, %v695_v0  ;;  %v446_v26 = vmul.f32 %v422_v17, %v697_v1  ;;  %v451_v28 = vmul.f32 %v418_v63, %v116_v20  ;;  %v452_v30 = vmul.f32 %v422_v17, %v122_v35 }
  0x56   :  { %v447_v32 = vmul.f32 %v426_v18, %v702_v9  ;;  %v448_v33 = vmul.f32 %v430_v22, %v704_v10  ;;  %v449_v8 = vmul.f32 %v434_v23, %v706_v11  ;;  %v453_v34 = vmul.f32 %v426_v18, %v128_v60 }
  0x57   :  { %v454_v36 = vmul.f32 %v430_v22, %v134_v61  ;;  %v455_v12 = vmul.f32 %v434_v23, %v140_v2  ;;  %v456_v37 = vmul.f32 %v438_v24, %v146_v16  ;;  %v469_v38 = vrot.slane %v451_v28, 7 }
  0x58   :  { %v450_v14 = vmul.f32 %v438_v24, %v708_v15  ;;  %v472_v39 = vrot.slane %v452_v30, 7  ;;  %v474_v0 = vrot.slane %v453_v34, 7  ;;  %v287_v41 = vmul.f32 %v231_v19, %v59_v31 }
  0x59   :  { %v471_v1 = vsel %vm470_vm0, %v469_v38, %v445_v25  ;;  %v476_v20 = vrot.slane %v454_v36, 7  ;;  %v478_v35 = vrot.slane %v455_v12, 7  ;;  %v480_v42 = vrot.slane %v456_v37, 7 }
  0x5a   :  { %v473_v9 = vsel %vm470_vm0, %v472_v39, %v446_v26  ;;  %v475_v10 = vsel %vm470_vm0, %v474_v0, %v447_v32  ;;  %v488_v11 = vsel %vm379_vm1, %v471_v1, 0.0  ;;  %v178_v43 = vrot.slane %v699_v3, %v177_v27  ;;  %v62_v39 = vld [vmem:[#allocation3 + $0x18] sm:$0xff] }
  0x5b   :  { %v477_v15 = vsel %vm470_vm0, %v476_v20, %v448_v33  ;;  %v479_v44 = vsel %vm470_vm0, %v478_v35, %v449_v8  ;;  %v489_v45 = vsel %vm379_vm1, %v473_v9, 0.0  ;;  %v295_v47 = vcombine.high %v287_v41, %v287_v41 }
  0x5c   :  { %v481_v48 = vsel %vm470_vm0, %v480_v42, %v450_v14  ;;  %v490_v49 = vadd.f32 %v489_v45, %v488_v11  ;;  %v491_v51 = vsel %vm379_vm1, %v475_v10, 0.0  ;;  %v493_v52 = vsel %vm379_vm1, %v477_v15, 0.0 }
  0x5d   :  { %v495_v53 = vsel %vm379_vm1, %v479_v44, 0.0  ;;  %v302_v54 = vrot.slane %v287_v41, %v692_v21  ;;  %v182_v56 = vrot.slane %v699_v3, %v181_v5  ;;  %v202_v57 = vrot.slane %v714_v29, %v686_v13 }
  0x5e   :  { %v492_v58 = vadd.f32 %v491_v51, %v490_v49  ;;  %v210_v60 = vrot.slane %v714_v29, %v177_v27  ;;  %v214_v61 = vrot.slane %v714_v29, %v181_v5  ;;  %v249_v63 = vcombine.low %v186_v40, %v190_v46  ;;  %v60_v40 = vld [vmem:[#allocation3 + $0x8] sm:$0xff]  ;;  %v61_v46 = vld [vmem:[#allocation3 + $0x10] sm:$0xff] }
  0x5f   :  { %v233_v3 = vcombine.low %v178_v43, %v182_v56  ;;  %v264_v13 = vrot.slane %v741_v59, %v692_v21  ;;  %v266_v2 = vcombine.low %v202_v57, %v206_v55  ;;  %v309_v16 = vrot.slane %v295_v47, %v692_v21 }
  0x60   :  { %v494_v17 = vadd.f32 %v493_v52, %v492_v58  ;;  %v257_v27 = vrot.slane %v249_v63, %v692_v21  ;;  %v267_v4 = vcombine.low %v210_v60, %v214_v61  ;;  %v310_v18 = vcombine.high %v302_v54, %v302_v54 }
  0x61   :  { %v497_v5 = vsel %vm379_vm1, %v481_v48, 0.0  ;;  %v247_v7 = vrot.slane %v233_v3, %v692_v21  ;;  %v311_v19 = vcombine.high %v309_v16, %v309_v16  ;;  %v380_v6 = vsel %vm379_vm1, %v302_v54, 0.0 }
  0x62   :  { %v496_v29 = vadd.f32 %v495_v53, %v494_v17  ;;  %v265_v22 = vcombine.low %v257_v27, %v264_v13  ;;  %v381_v55 = vsel %vm379_vm1, %v310_v18, 0.0  ;;  %v383_v24 = vsel %vm379_vm1, %v309_v16, 0.0 }
  0x63   :  { %v248_v59 = vcombine.low %v240_v62, %v247_v7  ;;  %v382_v23 = vadd.f32 %v381_v55, %v380_v6  ;;  %v274_v26 = vrot.slane %v266_v2, %v692_v21  ;;  %v281_v28 = vrot.slane %v267_v4, %v692_v21 }
  0x64   :  { %v498_v25 = vadd.f32 %v497_v5, %v496_v29  ;;  %v385_v30 = vsel %vm379_vm1, %v311_v19, 0.0  ;;  %v289_v32 = vmul.f32 %v265_v22, %v61_v46  ;;  %v519_v5 = vld [vmem:[#allocation2] ss:$0 sm:$0xff]  ;;  %vm511_vm2 = vcmask 1024  }
  0x65   :  { %v288_v31 = vmul.f32 %v248_v59, %v60_v40  ;;  %v384_v33 = vadd.f32 %v383_v24, %v382_v23  ;;  %v282_v50 = vcombine.low %v274_v26, %v281_v28 }
  0x66   :  { %499 = vadd.xlane.f32.xlu0 %v498_v25  ;;  %v329_v62 = vcombine.high %v289_v32, %v289_v32  ;;  %v336_v38 = vrot.slane %v289_v32, %v692_v21 }
  0x67   :  { %v312_v8 = vcombine.high %v288_v31, %v288_v31  ;;  %v319_v34 = vrot.slane %v288_v31, %v692_v21  ;;  %v386_v36 = vadd.f32 %v385_v30, %v384_v33  ;;  %v290_v42 = vmul.f32 %v282_v50, %v62_v39 }
  0x68   :  { %v343_v9 = vrot.slane %v329_v62, %v692_v21  ;;  %v344_v10 = vcombine.high %v336_v38, %v336_v38  ;;  %v395_v15 = vsel %vm379_vm1, %v336_v38, 0.0 }
  0x69   :  { %v326_v12 = vrot.slane %v312_v8, %v692_v21  ;;  %v327_v37 = vcombine.high %v319_v34, %v319_v34  ;;  %v387_v14 = vsel %vm379_vm1, %v319_v34, 0.0  ;;  %v346_v47 = vcombine.high %v290_v42, %v290_v42 }
  0x6a   :  { %v388_v0 = vadd.f32 %v387_v14, %v386_v36  ;;  %v345_v45 = vcombine.high %v343_v9, %v343_v9  ;;  %v353_v48 = vrot.slane %v290_v42, %v692_v21  ;;  %v397_v49 = vsel %vm379_vm1, %v344_v10, 0.0 }
  0x6b   :  { %v328_v41 = vcombine.high %v326_v12, %v326_v12  ;;  %v389_v1 = vsel %vm379_vm1, %v327_v37, 0.0  ;;  %v391_v20 = vsel %vm379_vm1, %v326_v12, 0.0  ;;  %v399_v52 = vsel %vm379_vm1, %v343_v9, 0.0 }
  0x6c   :  { %v390_v35 = vadd.f32 %v389_v1, %v388_v0  ;;  %v360_v54 = vrot.slane %v346_v47, %v692_v21  ;;  %v361_v56 = vcombine.high %v353_v48, %v353_v48  ;;  %v401_v57 = vsel %vm379_vm1, %v345_v45, 0.0 }
  0x6d   :  { %v393_v11 = vsel %vm379_vm1, %v328_v41, 0.0  ;;  %v403_v60 = vsel %vm379_vm1, %v353_v48, 0.0 }
  0x6e   :  { %v392_v43 = vadd.f32 %v391_v20, %v390_v35  ;;  %v362_v63 = vcombine.high %v360_v54, %v360_v54  ;;  %v405_v3 = vsel %vm379_vm1, %v361_v56, 0.0  ;;  %v407_v2 = vsel %vm379_vm1, %v360_v54, 0.0 }
  0x70   :  { %v394_v44 = vadd.f32 %v393_v11, %v392_v43  ;;  %v409_v17 = vsel %vm379_vm1, %v362_v63, 0.0 }
  0x72   :  { %v396_v51 = vadd.f32 %v395_v15, %v394_v44 }
  0x74   :  { %v398_v53 = vadd.f32 %v397_v49, %v396_v51 }
  0x76   :  { %v400_v58 = vadd.f32 %v399_v52, %v398_v53 }
  0x78   :  { %v402_v61 = vadd.f32 %v401_v57, %v400_v58 }
  0x7a   :  { %v404_v13 = vadd.f32 %v403_v60, %v402_v61 }
  0x7c   :  { %v406_v16 = vadd.f32 %v405_v3, %v404_v13 }
  0x7e   :  { %v408_v27 = vadd.f32 %v407_v2, %v406_v16 }
  0x80   :  { %v410_v4 = vadd.f32 %v409_v17, %v408_v27 }
  0x82   :  { %411 = vadd.xlane.f32.xlu0 %v410_v4 }
  0xf3   :  { %v500_v21 = vpop.xlane.xlu0 %499 }
  0xf4   :  { %v501_v18 = vmul.f32 0.125, %v500_v21 }
 0x10f   :  { %v412_v7 = vpop.xlane.xlu0 %411 }
 0x110   :  { %v502_v19 = vadd.f32 %v501_v18, %v412_v7 }
 0x112   :  { %v510_v6 = vadd.f32 %v519_v5, %v502_v19 }
 0x114   :  { %512 = vst.msk [vmem:[%s830_s5] sm:$0x3] %vm511_vm2, %v510_v6 }
 0x115   :  { %517 = vsyncpa [#allocation4], 1 }
 0x116   :  { %518 = vsyncpa [#allocation6], 1 }

</bundles_post_ra>
